<compile_context>
chip_gen: v7x
topology: tpu7x:2x2x1
jax: 0.10.0
libtpu: 0.0.40
codegen_flags: <defaults>
</compile_context>

<pallas_src>
import functools

import jax
import jax.numpy as jnp
from jax.experimental import pallas as pl
from jax.experimental.pallas import tpu as pltpu


# ---------------------------------------------------------------------------
# Kernel bodies
# ---------------------------------------------------------------------------

def _grouped_max_min(x, group):
    """Grouped max/min over contiguous groups of width `group` along the last axis.

    Single pass: an unrolled compare chain maintains the running max and min from the
    same loaded sub-slice (halves VMEM re-reads vs. two independent reductions).
    """
    bt, fk = x.shape
    if group == 1:
        return x, x
    xg = x.reshape(bt, fk // group, group)
    if group <= 32:
        cur_max = xg[:, :, 0]
        cur_min = cur_max
        for k in range(1, group):
            v = xg[:, :, k]
            cur_max = jnp.maximum(cur_max, v)
            cur_min = jnp.minimum(cur_min, v)
        return cur_max, cur_min
    # Very large groups: avoid a huge unroll, use the native reductions.
    return jnp.max(xg, axis=-1), jnp.min(xg, axis=-1)


def _maxmin_kernel_fused(x_ref, out_ref, *, group, num_units):
    # x block: (Bt, F). out block: (Bt, 2*num_units) = [maxes | mins] fused in-kernel.
    # Both stores are contiguous lane slices of one dense output block (no wrapper concat).
    mx, mn = _grouped_max_min(x_ref[...], group)
    out_ref[:, :num_units] = mx.astype(out_ref.dtype)
    out_ref[:, num_units:] = mn.astype(out_ref.dtype)


def _maxmin_kernel_tiled(x_ref, out_ref, *, group):
    # Feature-tiled path (very wide F): out block (Bt, 2, Gt). The wrapper's reshape of the
    # (B, 2, num_units) result to (B, 2*num_units) is a free contiguous view.
    mx, mn = _grouped_max_min(x_ref[...], group)
    out_ref[:, 0, :] = mx.astype(out_ref.dtype)
    out_ref[:, 1, :] = mn.astype(out_ref.dtype)


# ---------------------------------------------------------------------------
# Wrapper
# ---------------------------------------------------------------------------

def _sublane_multiple(dtype):
    itemsize = jnp.dtype(dtype).itemsize
    return {1: 32, 2: 16}.get(itemsize, 8)   # int8 -> 32, bf16/f16 -> 16, f32/i32 -> 8


def _round_up(x, m):
    return -(-x // m) * m


def _vmem_capacity_bytes():
    """Physical VMEM per core (128 MiB v5e/v6e, 64 MiB v7x). Conservative fallback."""
    try:
        info = pltpu.get_tpu_info()
        cap = getattr(info, "vmem_capacity_bytes", None)
        if cap:
            return int(cap)
    except Exception:
        pass
    return 64 * 1024 * 1024  # v7x-safe default


def maxmin(x, num_units, *, block_b=None, vmem_budget_bytes=None):
    """MaxMin over the last axis of a 2-D input (B, F) -> (B, 2*num_units)."""
    B, F = x.shape
    if F % num_units:
        raise ValueError(
            "number of features({}) is not a multiple of num_units({})".format(F, num_units))
    group = F // num_units
    itemsize = jnp.dtype(x.dtype).itemsize
    sublane = _sublane_multiple(x.dtype)

    # ---- per-generation VMEM budget & limit ----
    vmem_cap = _vmem_capacity_bytes()
    if vmem_budget_bytes is None:
        # ~24 MiB of tiles on 128 MiB parts (v5e/v6e), ~12 MiB on v7x's 64 MiB.
        vmem_budget_bytes = max(4 << 20, min(24 << 20, vmem_cap // 5))
    vmem_limit_bytes = min(64 << 20, (vmem_cap * 3) // 4)          # 64 MiB v5e/v6e, 48 MiB v7x
    vmem_limit_bytes = max(vmem_limit_bytes,
                           min((vmem_cap * 3) // 4, 2 * int(vmem_budget_bytes)))

    # Bytes per batch row: input tile x2 (double-buffered DMA) + 1x headroom for the
    # in-kernel grouped-reduce temporary, plus output tile x2 (+ slack).
    def per_row_bytes(gpb):
        return (3 * gpb * group + 3 * 2 * gpb) * itemsize

    def fits(bb, gpb):
        return bb * per_row_bytes(gpb) <= vmem_budget_bytes

    min_padded_b = _round_up(B, sublane)

    # ---- batch tile ----
    if block_b is None:
        rows = vmem_budget_bytes // per_row_bytes(num_units)
        block_b = max(sublane, min(4096, (rows // sublane) * sublane))
        # Keep >= 2 "parallel" batch blocks when the batch allows it so the grid can be
        # sharded across both TensorCores on v7x.
        if min_padded_b >= 2 * sublane:
            block_b = min(block_b, _round_up(min_padded_b // 2, sublane))
        block_b = min(block_b, min_padded_b)
    else:
        block_b = max(sublane, (int(block_b) // sublane) * sublane)
        block_b = min(block_b, min_padded_b)

    # ---- feature tile: full F when it fits; lane-dense 128-group tiles otherwise ----
    groups_per_block = num_units
    if not fits(block_b, groups_per_block):
        # 1) shrink the batch tile first (keeps the fused, fully lane-dense output path)
        while block_b > sublane and not fits(block_b, groups_per_block):
            block_b = max(sublane, ((block_b // 2) // sublane) * sublane)
    if not fits(block_b, groups_per_block):
        # 2) tile feature groups in lane-dense multiples of 128 (only for very wide F)
        g = (num_units // 128) * 128
        while g >= 128 and not (num_units % g == 0 and fits(block_b, g)):
            g -= 128
        if g >= 128:
            groups_per_block = g
        else:
            raise ValueError(
                "MaxMin tile (rows={}, features={}, dtype={}) does not fit the VMEM budget "
                "of {} bytes; raise vmem_budget_bytes.".format(
                    block_b, F, x.dtype, vmem_budget_bytes))

    # ---- pad the batch so block_b evenly tiles it (padded rows sliced off below) ----
    num_b_blocks = -(-B // block_b)
    b_padded = num_b_blocks * block_b
    xp = jnp.pad(x, ((0, b_padded - B), (0, 0))) if b_padded != B else x

    cost = pl.CostEstimate(
        flops=2 * b_padded * F,
        transcendentals=0,
        bytes_accessed=(b_padded * F + b_padded * 2 * num_units) * itemsize,
    )

    if groups_per_block == num_units:
        # Common path: fused single output, 1-D parallel grid over batch blocks.
        kernel = functools.partial(_maxmin_kernel_fused, group=group, num_units=num_units)
        out = pl.pallas_call(
            kernel,
            out_shape=jax.ShapeDtypeStruct((b_padded, 2 * num_units), x.dtype),
            grid=(num_b_blocks,),
            in_specs=[pl.BlockSpec((block_b, F), lambda i: (i, 0))],
            out_specs=pl.BlockSpec((block_b, 2 * num_units), lambda i: (i, 0)),
            compiler_params=pltpu.CompilerParams(
                dimension_semantics=("parallel",),
                vmem_limit_bytes=int(vmem_limit_bytes)),
            cost_estimate=cost,
        )(xp)
        return out[:B] if b_padded != B else out

    # Rare path: very wide F -> tile feature groups; output (B, 2, U), reshape is free.
    num_g_blocks = num_units // groups_per_block
    fb = groups_per_block * group
    kernel = functools.partial(_maxmin_kernel_tiled, group=group)
    out3 = pl.pallas_call(
        kernel,
        out_shape=jax.ShapeDtypeStruct((b_padded, 2, num_units), x.dtype),
        grid=(num_b_blocks, num_g_blocks),
        in_specs=[pl.BlockSpec((block_b, fb), lambda i, j: (i, j))],
        out_specs=pl.BlockSpec((block_b, 2, groups_per_block), lambda i, j: (i, 0, j)),
        compiler_params=pltpu.CompilerParams(
            dimension_semantics=("parallel", "parallel"),
            vmem_limit_bytes=int(vmem_limit_bytes)),
        cost_estimate=cost,
    )(xp)
    if b_padded != B:
        out3 = out3[:B]
    return out3.reshape(B, 2 * num_units)   # contiguous -> free view


def maxmin_ref(x, num_units):
    # Pure-JAX reference mirroring the PyTorch module exactly.
    B, F = x.shape
    g = F // num_units
    xg = x.reshape(B, num_units, g)
    return jnp.concatenate([xg.max(axis=-1), xg.min(axis=-1)], axis=-1)


if __name__ == "__main__":
    k1, k2, k3 = jax.random.split(jax.random.PRNGKey(0), 3)

    # Small deterministic example matching the module's dense-activation use.
    B, F, num_units = 8, 32, 8            # group size = 4, output (8, 16)
    x = jax.random.normal(k1, (B, F), dtype=jnp.float32)
    out = maxmin(x, num_units)
    jax.block_until_ready(out)
    ref = maxmin_ref(x, num_units)
    assert out.shape == (B, 2 * num_units)
    assert jnp.allclose(out, ref), "Pallas MaxMin does not match reference"

    # Ragged batch + multi-block grid path (exercises padding and pipelined grid).
    B2 = 10
    x2 = jax.random.normal(k2, (B2, F), dtype=jnp.float32)
    out2 = maxmin(x2, num_units, block_b=8)
    jax.block_until_ready(out2)
    assert out2.shape == (B2, 2 * num_units)
    assert jnp.allclose(out2, maxmin_ref(x2, num_units)), "ragged-batch path mismatch"

    # Feature-tiled path (forced with a tiny budget) - group=2, 128-group lane tiles.
    B3, U3 = 16, 256                       # F = 512, group = 2
    x3 = jax.random.normal(k3, (B3, 2 * U3), dtype=jnp.float32)
    out3 = maxmin(x3, U3, vmem_budget_bytes=64 * 1024)
    jax.block_until_ready(out3)
    assert out3.shape == (B3, 2 * U3)
    assert jnp.allclose(out3, maxmin_ref(x3, U3)), "feature-tiled path mismatch"

    print("KERNEL_OK")
</pallas_src>

<mosaic_0001>
module attributes {stable_mosaic.version = 11 : i64} {
  func.func @_maxmin_kernel_fused(%arg0: i32, %arg1: memref<8x32xf32, #tpu.memory_space<vmem>>, %arg2: memref<8x16xf32, #tpu.memory_space<vmem>>) attributes {dimension_semantics = [#tpu.dimension_semantics<parallel>], iteration_bounds = array<i64: 1>, scalar_prefetch = 0 : i64, scratch_operands = 0 : i64, tpu.core_type = #tpu.core_type<tc>, window_params = [{transform_indices = @transform_0, window_bounds = array<i64: 8, 32>}, {transform_indices = @transform_1, window_bounds = array<i64: 8, 16>}]} {
    %c0 = arith.constant 0 : index
    %c0_0 = arith.constant 0 : index
    %0 = vector.load %arg1[%c0, %c0_0] : memref<8x32xf32, #tpu.memory_space<vmem>>, vector<8x32xf32>
    %1 = vector.shape_cast %0 : vector<8x32xf32> to vector<8x8x4xf32>
    %2 = vector.extract_strided_slice %1 {offsets = [0, 0, 0], sizes = [8, 8, 1], strides = [1, 1, 1]} : vector<8x8x4xf32> to vector<8x8x1xf32>
    %3 = vector.shape_cast %2 : vector<8x8x1xf32> to vector<8x8xf32>
    %4 = vector.extract_strided_slice %1 {offsets = [0, 0, 1], sizes = [8, 8, 1], strides = [1, 1, 1]} : vector<8x8x4xf32> to vector<8x8x1xf32>
    %5 = vector.shape_cast %4 : vector<8x8x1xf32> to vector<8x8xf32>
    %6 = arith.maximumf %3, %5 : vector<8x8xf32>
    %7 = arith.minimumf %3, %5 : vector<8x8xf32>
    %8 = vector.extract_strided_slice %1 {offsets = [0, 0, 2], sizes = [8, 8, 1], strides = [1, 1, 1]} : vector<8x8x4xf32> to vector<8x8x1xf32>
    %9 = vector.shape_cast %8 : vector<8x8x1xf32> to vector<8x8xf32>
    %10 = arith.maximumf %6, %9 : vector<8x8xf32>
    %11 = arith.minimumf %7, %9 : vector<8x8xf32>
    %12 = vector.extract_strided_slice %1 {offsets = [0, 0, 3], sizes = [8, 8, 1], strides = [1, 1, 1]} : vector<8x8x4xf32> to vector<8x8x1xf32>
    %13 = vector.shape_cast %12 : vector<8x8x1xf32> to vector<8x8xf32>
    %14 = arith.maximumf %10, %13 : vector<8x8xf32>
    %15 = arith.minimumf %11, %13 : vector<8x8xf32>
    %c0_1 = arith.constant 0 : index
    %c0_2 = arith.constant 0 : index
    %16 = vector.load %arg2[%c0_1, %c0_2] : memref<8x16xf32, #tpu.memory_space<vmem>>, vector<8x8xf32>
    tpu.vector_store %arg2[%c0_1, %c0_2], %14 {strides = array<i32>} : memref<8x16xf32, #tpu.memory_space<vmem>>, vector<8x8xf32>,
    %c0_3 = arith.constant 0 : index
    %c8 = arith.constant 8 : index
    %17 = vector.load %arg2[%c0_3, %c8] : memref<8x16xf32, #tpu.memory_space<vmem>>, vector<8x8xf32>
    tpu.vector_store %arg2[%c0_3, %c8], %15 {strides = array<i32>} : memref<8x16xf32, #tpu.memory_space<vmem>>, vector<8x8xf32>,
    return
  }
  func.func @transform_0(%arg0: i32) -> (i32, i32) {
    %c0_i32 = arith.constant 0 : i32
    %c0_i32_0 = arith.constant 0 : i32
    return %arg0, %c0_i32 : i32, i32
  }
  func.func @transform_1(%arg0: i32) -> (i32, i32) {
    %c0_i32 = arith.constant 0 : i32
    %c0_i32_0 = arith.constant 0 : i32
    return %arg0, %c0_i32 : i32, i32
  }
}

</mosaic_0001>

<bundles_post_ra>
// kernel: tpu_custom_call.1
= control target key start
LH: loop header
LB: loop body
LE: loop exit
PB: predicated region body
PF: predicated region fallthrough
CT: control target
= control target key end

     0   :  { %6 = vsyncpa [#allocation3], 0  ;;  %s685_s0 = inlined_call_operand.hbm [shape: f32[8,32], index: 0, kind: input, shape index: {}]   ;;  %s686_s1 = inlined_call_operand.hbm [shape: f32[8,16], index: 1, kind: output, shape index: {}]  }
   0x1   :  { %7 = vsyncpa [#allocation4], 0  ;;  %s546_s6 = smov [#allocation2]   ;;  %s498_s10 = scalar_lea.hbm %s685_s0, 128 }
   0x2   :  { %s14_s7 = sshll.u32 %s546_s6, 4  ;;  %p499_p0 = scmp.ne.s32.totalorder %s685_s0, %s498_s10  ;;  %s15_s7 = int_to_ptr.vmem [resolvable:$true] %s14_s7 }
   0x3   :  { %p502_p1 = scmp.lt.u32.totalorder %s498_s10, %s685_s0 }
   0x5   :  { %p504_p2 = pnand %p502_p1, %p499_p0 }
   0x7   :  { %507 = shalt.err (!%p504_p2)
}
   0x8   :  { %s508_s15 = scalar_lea.vmem %s15_s7, 128  ;;  %p513_p4 = scmp.lt.s32.totalorder %s15_s7, %s15_s7 }
   0x9   :  { %p509_p3 = scmp.ne.s32.totalorder %s15_s7, %s508_s15  ;;  %p514_p5 = scmp.lt.s32.totalorder %s508_s15, %s508_s15 }
   0xb   :  { %p515_p6 = por %p514_p5, %p513_p4 }
   0xd   :  { %p516_p7 = pnand %p515_p6, %p509_p3 }
   0xf   :  { %519 = shalt.err (!%p516_p7)
}
  0x10   :  { %17 = dma.hbm_to_vmem [thread:$0]  %s685_s0, 128, %s15_s7, [#allocation3]  }
  0x11   :  { %542 = dma.done.wait [#allocation3], 128  }
  0x12   :  { %543 = vsyncadd [#allocation3], 4294967168  ;;  %v21_v0 = vld [vmem:[#allocation2] sm:$0xff]  ;;  %s547_s18 = smov 116   ;;  %s548_s19 = smov 124   ;;  %v49_v5 = vlaneseq  ;;  %v558_v50 = vmov 0  }
  0x13   :  { %29 = vrot.lane.b32.xlu1 %v21_v0, %s547_s18  ;;  %23 = vrot.lane.b32.xlu0 %v21_v0, %s548_s19  ;;  %s549_s20 = smov 112   ;;  %s550_s21 = smov 120   ;;  %v554_v3 = vmov 1983009808   ;;  %v555_v10 = vmov 1934713408  }
  0x14   :  { %s551_s22 = smov 104   ;;  %s552_s23 = smov 108   ;;  %v47_v4 = vunpack.c.l.s4 %v554_v3  ;;  %v584_v9 = vshrl.u32 %v49_v5, 7  ;;  %v111_v11 = vunpack.c.l.s4 %v555_v10  ;;  %497 = vset.pattern.permute.xlu0 %v558_v50  ;;  %496 = vset.pattern.permute.xlu1 %v558_v50  ;;  %vm374_vm0 = vcmask 1041409  }
  0x15   :  { %s553_s24 = smov 100   ;;  %s556_s0 = smov 127   ;;  %vm376_vm1 = vcmask 1042434   ;;  %vm378_vm2 = vcmask 1043459   ;;  %vm380_vm3 = vcmask 1044484   ;;  %vm382_vm4 = vcmask 1045509  }
  0x16   :  { %v48_v8 = vunpack.c.0.s8 %v47_v4  ;;  %v112_v17 = vunpack.c.0.s8 %v111_v11  ;;  %s557_s25 = smov 126   ;;  %s559_s26 = smov 125   ;;  %vm384_vm5 = vcmask 1046534   ;;  %vm386_vm6 = vcmask 1047559  }
  0x17   :  { %32 = vrot.lane.b32.xlu1 %v21_v0, %s549_s20  ;;  %26 = vrot.lane.b32.xlu0 %v21_v0, %s550_s21  ;;  %vm389_vm7 = vcmask 64512   ;;  %s560_s27 = smov [#allocation5]   ;;  %vm464_vm8 = vcmask 130112  }
  0x18   :  { %v51_v15 = vsub.s32 %v48_v8, %v584_v9  ;;  %v115_v23 = vsub.s32 %v112_v17, %v584_v9  ;;  %s472_s28 = sshll.u32 %s560_s27, 4  ;;  %s473_s28 = int_to_ptr.vmem [resolvable:$true] %s472_s28 }
  0x19   :  { %s520_s29 = scalar_lea.vmem %s473_s28, 128  ;;  %p525_p9 = scmp.lt.s32.totalorder %s473_s28, %s473_s28 }
  0x1a   :  { %p521_p8 = scmp.ne.s32.totalorder %s473_s28, %s520_s29  ;;  %p526_p10 = scmp.lt.s32.totalorder %s520_s29, %s520_s29 }
  0x1b   :  { %38 = vrot.lane.b32.xlu1 %v21_v0, %s551_s22  ;;  %35 = vrot.lane.b32.xlu0 %v21_v0, %s552_s23 }
  0x1c   :  { %p527_p11 = por %p526_p10, %p525_p9 }
  0x1e   :  { %p528_p12 = pnand %p527_p11, %p521_p8 }
  0x1f   :  { %41 = vrot.lane.b32.xlu0 %v21_v0, %s553_s24 }
  0x85   :  { %v30_v1 = vpop.permute.xlu1 %29  ;;  %v24_v2 = vpop.permute.xlu0 %23 }
  0x86   :  { %v60_v16 = vcombine.low %v24_v2, %v30_v1  ;;  %v61_v35 = vcombine.high %v24_v2, %v30_v1 }
  0x88   :  { %v68_v21 = vrot.slane %v60_v16, %v51_v15  ;;  %v75_v43 = vrot.slane %v61_v35, %v51_v15 }
  0x89   :  { %v33_v6 = vpop.permute.xlu1 %32  ;;  %v27_v7 = vpop.permute.xlu0 %26 }
  0x8a   :  { %v44_v12 = vcombine.low %v21_v0, %v27_v7  ;;  %v45_v30 = vcombine.high %v21_v0, %v27_v7 }
  0x8c   :  { %v52_v18 = vrot.slane %v44_v12, %v51_v15  ;;  %v59_v40 = vrot.slane %v45_v30, %v51_v15 }
  0x8d   :  { %v39_v13 = vpop.permute.xlu1 %38  ;;  %v36_v14 = vpop.permute.xlu0 %35 }
  0x8e   :  { %v76_v19 = vcombine.low %v33_v6, %v39_v13  ;;  %v108_v24 = vcombine.low %v52_v18, %v68_v21  ;;  %v109_v31 = vcombine.high %v52_v18, %v68_v21  ;;  %v77_v33 = vcombine.high %v33_v6, %v39_v13 }
  0x8f   :  { %v124_v47 = vcombine.low %v59_v40, %v75_v43  ;;  %v125_v54 = vcombine.high %v59_v40, %v75_v43 }
  0x90   :  { %v84_v25 = vrot.slane %v76_v19, %v51_v15  ;;  %v116_v32 = vrot.slane %v108_v24, %v115_v23  ;;  %v123_v41 = vrot.slane %v109_v31, %v115_v23  ;;  %v91_v42 = vrot.slane %v77_v33, %v51_v15 }
  0x91   :  { %v42_v20 = vpop.permute.xlu0 %41  ;;  %v132_v49 = vrot.slane %v124_v47, %v115_v23  ;;  %v139_v56 = vrot.slane %v125_v54, %v115_v23 }
  0x92   :  { %v92_v22 = vcombine.low %v36_v14, %v42_v20  ;;  %v93_v27 = vcombine.high %v36_v14, %v42_v20 }
  0x94   :  { %v100_v26 = vrot.slane %v92_v22, %v51_v15  ;;  %v107_v36 = vrot.slane %v93_v27, %v51_v15 }
  0x96   :  { %v140_v28 = vcombine.low %v84_v25, %v100_v26  ;;  %v141_v29 = vcombine.high %v84_v25, %v100_v26  ;;  %v156_v44 = vcombine.low %v91_v42, %v107_v36  ;;  %v157_v52 = vcombine.high %v91_v42, %v107_v36 }
  0x98   :  { %v148_v34 = vrot.slane %v140_v28, %v115_v23  ;;  %v155_v37 = vrot.slane %v141_v29, %v115_v23  ;;  %v164_v48 = vrot.slane %v156_v44, %v115_v23  ;;  %v171_v55 = vrot.slane %v157_v52, %v115_v23 }
  0x9a   :  { %v588_v38 = vcombine.low %v116_v32, %v148_v34  ;;  %v590_v39 = vcombine.high %v116_v32, %v148_v34  ;;  %v596_v45 = vcombine.low %v123_v41, %v155_v37  ;;  %v598_v46 = vcombine.high %v123_v41, %v155_v37 }
  0x9b   :  { %v608_v51 = vcombine.low %v132_v49, %v164_v48  ;;  %v614_v53 = vcombine.high %v132_v49, %v164_v48  ;;  %v622_v57 = vcombine.low %v139_v56, %v171_v55  ;;  %v628_v58 = vcombine.high %v139_v56, %v171_v55 }
  0x9c   :  { %190 = vrot.lane.b32.xlu0 %v590_v39, %s556_s0  ;;  %188 = vrot.lane.b32.xlu1 %v588_v38, %s556_s0 }
  0xa0   :  { %194 = vrot.lane.b32.xlu0 %v598_v46, %s556_s0  ;;  %192 = vrot.lane.b32.xlu1 %v596_v45, %s556_s0 }
  0xa4   :  { %230 = vrot.lane.b32.xlu0 %v590_v39, %s557_s25  ;;  %228 = vrot.lane.b32.xlu1 %v588_v38, %s557_s25 }
  0xa8   :  { %232 = vrot.lane.b32.xlu0 %v596_v45, %s557_s25  ;;  %196 = vrot.lane.b32.xlu1 %v608_v51, %s556_s0 }
  0xac   :  { %234 = vrot.lane.b32.xlu0 %v598_v46, %s557_s25  ;;  %198 = vrot.lane.b32.xlu1 %v614_v53, %s556_s0 }
  0xb0   :  { %270 = vrot.lane.b32.xlu0 %v590_v39, %s559_s26  ;;  %268 = vrot.lane.b32.xlu1 %v588_v38, %s559_s26 }
  0xb4   :  { %236 = vrot.lane.b32.xlu0 %v608_v51, %s557_s25  ;;  %200 = vrot.lane.b32.xlu1 %v622_v57, %s556_s0 }
  0xb8   :  { %202 = vrot.lane.b32.xlu0 %v628_v58, %s556_s0  ;;  %272 = vrot.lane.b32.xlu1 %v596_v45, %s559_s26 }
  0xbc   :  { %274 = vrot.lane.b32.xlu0 %v598_v46, %s559_s26  ;;  %238 = vrot.lane.b32.xlu1 %v614_v53, %s557_s25 }
  0xc0   :  { %276 = vrot.lane.b32.xlu0 %v608_v51, %s559_s26  ;;  %240 = vrot.lane.b32.xlu1 %v622_v57, %s557_s25 }
  0xc4   :  { %278 = vrot.lane.b32.xlu0 %v614_v53, %s559_s26  ;;  %242 = vrot.lane.b32.xlu1 %v628_v58, %s557_s25 }
  0xc8   :  { %282 = vrot.lane.b32.xlu0 %v628_v58, %s559_s26  ;;  %280 = vrot.lane.b32.xlu1 %v622_v57, %s559_s26 }
 0x10e   :  { %v191_v59 = vpop.permute.xlu0 %190  ;;  %v189_v60 = vpop.permute.xlu1 %188 }
 0x10f   :  { %v213_v6 = vmax.f32 %v590_v39, %v191_v59  ;;  %v212_v7 = vmax.f32 %v588_v38, %v189_v60  ;;  %v221_v13 = vmin.f32 %v590_v39, %v191_v59  ;;  %v220_v26 = vmin.f32 %v588_v38, %v189_v60 }
 0x112   :  { %v195_v61 = vpop.permute.xlu0 %194  ;;  %v193_v62 = vpop.permute.xlu1 %192 }
 0x113   :  { %v214_v19 = vmax.f32 %v596_v45, %v193_v62  ;;  %v222_v20 = vmin.f32 %v596_v45, %v193_v62  ;;  %v223_v27 = vmin.f32 %v598_v46, %v195_v61  ;;  %v215_v34 = vmax.f32 %v598_v46, %v195_v61 }
 0x116   :  { %v231_v63 = vpop.permute.xlu0 %230  ;;  %v229_v0 = vpop.permute.xlu1 %228 }
 0x117   :  { %v253_v8 = vmax.f32 %v213_v6, %v231_v63  ;;  %v252_v10 = vmax.f32 %v212_v7, %v229_v0  ;;  %v261_v16 = vmin.f32 %v221_v13, %v231_v63  ;;  %v260_v30 = vmin.f32 %v220_v26, %v229_v0 }
 0x11a   :  { %v233_v1 = vpop.permute.xlu0 %232  ;;  %v197_v2 = vpop.permute.xlu1 %196 }
 0x11b   :  { %v254_v22 = vmax.f32 %v214_v19, %v233_v1  ;;  %v262_v23 = vmin.f32 %v222_v20, %v233_v1  ;;  %v224_v35 = vmin.f32 %v608_v51, %v197_v2  ;;  %v216_v42 = vmax.f32 %v608_v51, %v197_v2 }
 0x11e   :  { %v235_v3 = vpop.permute.xlu0 %234  ;;  %v199_v4 = vpop.permute.xlu1 %198 }
 0x11f   :  { %v263_v31 = vmin.f32 %v223_v27, %v235_v3  ;;  %v255_v39 = vmax.f32 %v215_v34, %v235_v3  ;;  %v225_v43 = vmin.f32 %v614_v53, %v199_v4  ;;  %v217_v50 = vmax.f32 %v614_v53, %v199_v4 }
 0x122   :  { %v271_v11 = vpop.permute.xlu0 %270  ;;  %v269_v12 = vpop.permute.xlu1 %268 }
 0x123   :  { %v293_v14 = vmax.f32 %v253_v8, %v271_v11  ;;  %v292_v15 = vmax.f32 %v252_v10, %v269_v12  ;;  %v301_v21 = vmin.f32 %v261_v16, %v271_v11  ;;  %v300_v36 = vmin.f32 %v260_v30, %v269_v12 }
 0x125   :  { %320 = vperm.xlu0 %497, %v293_v14   ;;  %317 = vperm.xlu1 %496, %v292_v15   ;;  %v341_v15 = vand.u32 127, %v49_v5 }
 0x126   :  { %v237_v17 = vpop.permute.xlu0 %236  ;;  %v201_v18 = vpop.permute.xlu1 %200 }
 0x127   :  { %v264_v40 = vmin.f32 %v224_v35, %v237_v17  ;;  %v256_v47 = vmax.f32 %v216_v42, %v237_v17  ;;  %v226_v52 = vmin.f32 %v622_v57, %v201_v18  ;;  %v218_v60 = vmax.f32 %v622_v57, %v201_v18 }
 0x128   :  { %v423_v17 = vadd.s32 4294967288, %v341_v15 }
 0x129   :  { %403 = vperm.xlu0 %497, %v301_v21  }
 0x12a   :  { %v203_v24 = vpop.permute.xlu0 %202  ;;  %v273_v25 = vpop.permute.xlu1 %272  ;;  %v426_v20 = vsub.s32 %v423_v17, %v584_v9 }
 0x12b   :  { %v294_v28 = vmax.f32 %v254_v22, %v273_v25  ;;  %v302_v29 = vmin.f32 %v262_v23, %v273_v25  ;;  %v219_v0 = vmax.f32 %v628_v58, %v203_v24  ;;  %v227_v3 = vmin.f32 %v628_v58, %v203_v24 }
 0x12c   :  { %v344_v58 = vsub.s32 %v341_v15, %v584_v9 }
 0x12d   :  { %406 = vperm.xlu0 %497, %v302_v29   ;;  %323 = vperm.xlu1 %496, %v294_v28  }
 0x12e   :  { %v275_v32 = vpop.permute.xlu0 %274  ;;  %v239_v33 = vpop.permute.xlu1 %238 }
 0x12f   :  { %v303_v37 = vmin.f32 %v263_v31, %v275_v32  ;;  %v295_v44 = vmax.f32 %v255_v39, %v275_v32  ;;  %v265_v48 = vmin.f32 %v225_v43, %v239_v33  ;;  %v257_v56 = vmax.f32 %v217_v50, %v239_v33 }
 0x131   :  { %409 = vperm.xlu0 %497, %v303_v37   ;;  %400 = vperm.xlu1 %496, %v300_v36  }
 0x132   :  { %v277_v38 = vpop.permute.xlu0 %276  ;;  %v241_v41 = vpop.permute.xlu1 %240 }
 0x133   :  { %v304_v45 = vmin.f32 %v264_v40, %v277_v38  ;;  %v296_v54 = vmax.f32 %v256_v47, %v277_v38  ;;  %v266_v59 = vmin.f32 %v226_v52, %v241_v41  ;;  %v258_v63 = vmax.f32 %v218_v60, %v241_v41 }
 0x135   :  { %412 = vperm.xlu0 %497, %v304_v45   ;;  %326 = vperm.xlu1 %496, %v295_v44  }
 0x136   :  { %v279_v46 = vpop.permute.xlu0 %278  ;;  %v243_v49 = vpop.permute.xlu1 %242 }
 0x137   :  { %v305_v55 = vmin.f32 %v265_v48, %v279_v46  ;;  %v297_v61 = vmax.f32 %v257_v56, %v279_v46  ;;  %v259_v2 = vmax.f32 %v219_v0, %v243_v49  ;;  %v267_v6 = vmin.f32 %v227_v3, %v243_v49 }
 0x139   :  { %329 = vperm.xlu1 %496, %v296_v54   ;;  %415 = vperm.xlu0 %497, %v305_v55  }
 0x13a   :  { %v281_v51 = vpop.permute.xlu1 %280  ;;  %v283_v53 = vpop.permute.xlu0 %282 }
 0x13b   :  { %v306_v62 = vmin.f32 %v266_v59, %v281_v51  ;;  %v298_v1 = vmax.f32 %v258_v63, %v281_v51  ;;  %v299_v4 = vmax.f32 %v259_v2, %v283_v53  ;;  %v307_v7 = vmin.f32 %v267_v6, %v283_v53 }
 0x13d   :  { %332 = vperm.xlu1 %496, %v297_v61   ;;  %418 = vperm.xlu0 %497, %v306_v62  }
 0x141   :  { %335 = vperm.xlu1 %496, %v298_v1  }
 0x145   :  { %338 = vperm.xlu1 %496, %v299_v4  }
 0x149   :  { %421 = vperm.xlu1 %496, %v307_v7  }
 0x1a4   :  { %v321_v8 = vpop.permute.xlu0 %320  ;;  %v318_v57 = vpop.permute.xlu1 %317 }
 0x1a5   :  { %v349_v23 = vrot.slane %v321_v8, %v344_v58  ;;  %v345_v24 = vrot.slane %v318_v57, %v344_v58 }
 0x1a7   :  { %v375_v32 = vsel %vm374_vm0, %v349_v23, %v345_v24 }
 0x1a8   :  { %v404_v10 = vpop.permute.xlu0 %403 }
 0x1a9   :  { %v431_v25 = vrot.slane %v404_v10, %v426_v20 }
 0x1ac   :  { %v407_v11 = vpop.permute.xlu0 %406  ;;  %v324_v12 = vpop.permute.xlu1 %323 }
 0x1ad   :  { %v353_v27 = vrot.slane %v324_v12, %v344_v58  ;;  %v435_v5 = vrot.slane %v407_v11, %v426_v20 }
 0x1af   :  { %v377_v34 = vsel %vm376_vm1, %v353_v27, %v375_v32 }
 0x1b0   :  { %v401_v13 = vpop.permute.xlu1 %400  ;;  %v410_v14 = vpop.permute.xlu0 %409 }
 0x1b1   :  { %v427_v21 = vrot.slane %v401_v13, %v426_v20  ;;  %v439_v36 = vrot.slane %v410_v14, %v426_v20 }
 0x1b3   :  { %v456_v28 = vsel %vm374_vm0, %v431_v25, %v427_v21 }
 0x1b4   :  { %v327_v16 = vpop.permute.xlu1 %326  ;;  %v413_v18 = vpop.permute.xlu0 %412  ;;  %v457_v35 = vsel %vm376_vm1, %v435_v5, %v456_v28 }
 0x1b5   :  { %v357_v29 = vrot.slane %v327_v16, %v344_v58  ;;  %v443_v40 = vrot.slane %v413_v18, %v426_v20  ;;  %v458_v42 = vsel %vm378_vm2, %v439_v36, %v457_v35 }
 0x1b7   :  { %v379_v37 = vsel %vm378_vm2, %v357_v29, %v377_v34  ;;  %v459_v49 = vsel %vm380_vm3, %v443_v40, %v458_v42 }
 0x1b8   :  { %v330_v19 = vpop.permute.xlu1 %329  ;;  %v416_v26 = vpop.permute.xlu0 %415 }
 0x1b9   :  { %v361_v30 = vrot.slane %v330_v19, %v344_v58  ;;  %v447_v43 = vrot.slane %v416_v26, %v426_v20 }
 0x1bb   :  { %v381_v38 = vsel %vm380_vm3, %v361_v30, %v379_v37  ;;  %v460_v52 = vsel %vm382_vm4, %v447_v43, %v459_v49 }
 0x1bc   :  { %v333_v22 = vpop.permute.xlu1 %332  ;;  %v419_v39 = vpop.permute.xlu0 %418 }
 0x1bd   :  { %v365_v33 = vrot.slane %v333_v22, %v344_v58  ;;  %v451_v47 = vrot.slane %v419_v39, %v426_v20 }
 0x1bf   :  { %v383_v44 = vsel %vm382_vm4, %v365_v33, %v381_v38  ;;  %v461_v55 = vsel %vm384_vm5, %v451_v47, %v460_v52 }
 0x1c0   :  { %v336_v31 = vpop.permute.xlu1 %335 }
 0x1c1   :  { %v369_v9 = vrot.slane %v336_v31, %v344_v58 }
 0x1c3   :  { %v385_v48 = vsel %vm384_vm5, %v369_v9, %v383_v44 }
 0x1c4   :  { %v339_v41 = vpop.permute.xlu1 %338 }
 0x1c5   :  { %v373_v45 = vrot.slane %v339_v41, %v344_v58 }
 0x1c7   :  { %v387_v46 = vsel %vm386_vm6, %v373_v45, %v385_v48 }
 0x1c8   :  { %v422_v50 = vpop.permute.xlu1 %421  ;;  %390 = vst.msk [vmem:[#allocation5] sm:$0xff] %vm389_vm7, %v387_v46 }
 0x1c9   :  { %v455_v54 = vrot.slane %v422_v50, %v426_v20 }
 0x1cb   :  { %v462_v56 = vsel %vm386_vm6, %v455_v54, %v461_v55 }
 0x1cc   :  { %465 = vst.msk [vmem:[#allocation5] sm:$0xff] %vm464_vm8, %v462_v56 }
 0x1cd   :  { %531 = shalt.err (!%p528_p12)
}
 0x1ce   :  { %s532_s3 = scalar_lea.hbm %s686_s1, 128 }
 0x1cf   :  { %p533_p13 = scmp.ne.s32.totalorder %s686_s1, %s532_s3  ;;  %p536_p0 = scmp.lt.u32.totalorder %s532_s3, %s686_s1 }
 0x1d1   :  { %p538_p1 = pnand %p536_p0, %p533_p13 }
 0x1d3   :  { %541 = shalt.err (!%p538_p1)
}
 0x1d4   :  { %475 = dma.vmem_to_hbm [thread:$0]  %s473_s28, 128, %s686_s1, [#allocation4]  }
 0x1d5   :  { %544 = dma.done.wait [#allocation4], 128  }
 0x1d6   :  { %545 = vsyncadd [#allocation4], 4294967168 }
 0x1d7   :  { %479 = vsyncpa [#allocation3], 1 }
 0x1d8   :  { %480 = vsyncpa [#allocation4], 1 }

</bundles_post_ra>
